<compile_context>
chip_gen: v7x
topology: tpu7x:2x2x1
jax: 0.10.0
libtpu: 0.0.40
codegen_flags: <defaults>
</compile_context>

<pallas_src>
import jax
import jax.numpy as jnp
from jax import lax
from jax.experimental import pallas as pl
from jax.experimental.pallas import tpu as pltpu

BN_EPS = 1e-5
_TARGET_BLOCK_BYTES = 8 << 20  # aim ~8 MiB of x+out traffic per grid step


# ---------------------------------------------------------------------------
# Generation-aware VMEM budget & tile selection
# ---------------------------------------------------------------------------
def _vmem_capacity_bytes():
    try:
        info = pltpu.get_tpu_info()
        cap = getattr(info, "vmem_capacity_bytes", None)
        if cap:
            return int(cap)
    except Exception:
        pass
    return 64 << 20  # conservative (v7x-sized) fallback


def _vmem_budget_bytes():
    cap = _vmem_capacity_bytes()
    if cap >= (128 << 20):      # v5e / v6e: 128 MiB physical VMEM
        return 96 << 20
    if cap >= (64 << 20):       # v7x: 64 MiB physical per TensorCore
        return 44 << 20
    return max(16 << 20, cap // 2)


def _choose_tiles(n, c_in, c_out, length, budget):
    """Pick (TL, TN): lane tile along L and batch tile along N."""
    tl = length                                    # fallback: full-extent L block
    for cand in (2048, 1024, 512, 256, 128):
        if length % cand == 0:
            tl = cand
            break
    per_n = 4 * (c_in + c_out) * tl                # f32 x-row + out-row bytes per batch elem
    by_target = max(1, _TARGET_BLOCK_BYTES // per_n)
    by_vmem = max(1, (budget - (4 << 20)) // (2 * per_n))   # double-buffered x + out
    cap = int(min(n, by_target, by_vmem))
    tn = 1
    for cand in range(cap, 0, -1):
        if n % cand == 0:
            tn = cand
            break
    return tl, tn


# ---------------------------------------------------------------------------
# Pass 1a: Gram statistics (used when Cin < Cout).  Per-block partials.
# ---------------------------------------------------------------------------
def _gram_stats_kernel(x_ref, sx_ref, g_ref):
    # x_ref: (TN, Cin, TL); sx_ref: (1, Cin, 1); g_ref: (1, Cin, Cin)
    sx_ref[...] = jnp.zeros_like(sx_ref)
    g_ref[...] = jnp.zeros_like(g_ref)

    @pl.loop(0, x_ref.shape[0])
    def _(i):
        xv = x_ref[i].astype(jnp.float32)                    # (Cin, TL)
        sx_ref[0] += jnp.sum(xv, axis=1, keepdims=True)      # (Cin, 1)
        g_ref[0] += lax.dot_general(                         # (Cin, Cin) = xv @ xv^T
            xv, xv, (((1,), (1,)), ((), ())),
            preferred_element_type=jnp.float32)


# ---------------------------------------------------------------------------
# Pass 1b: y statistics (used when Cin >= Cout).  Per-block partials.
# ---------------------------------------------------------------------------
def _y_stats_kernel(x_ref, w_ref, sy_ref, sy2_ref):
    # x_ref: (TN, Cin, TL); w_ref: (Cout, Cin); sy/sy2: (1, Cout, 1)
    sy_ref[...] = jnp.zeros_like(sy_ref)
    sy2_ref[...] = jnp.zeros_like(sy2_ref)
    w = w_ref[...]

    @pl.loop(0, x_ref.shape[0])
    def _(i):
        y = jnp.dot(w, x_ref[i], preferred_element_type=jnp.float32)  # (Cout, TL)
        sy_ref[0] += jnp.sum(y, axis=1, keepdims=True)
        sy2_ref[0] += jnp.sum(y * y, axis=1, keepdims=True)


# ---------------------------------------------------------------------------
# Pass 2: out = relu(W_scaled @ x + shift), lane-dense (Cout, TL) tiles.
# ---------------------------------------------------------------------------
def _apply_kernel(x_ref, w_ref, shift_ref, o_ref):
    # x_ref: (TN, Cin, TL); w_ref: (Cout, Cin) (scale folded); shift: (Cout, 1)
    w = w_ref[...]
    shift = shift_ref[...]

    @pl.loop(0, x_ref.shape[0])
    def _(i):
        y = jnp.dot(w, x_ref[i], preferred_element_type=jnp.float32)  # (Cout, TL)
        o_ref[i] = jnp.maximum(y + shift, 0.0).astype(o_ref.dtype)


# ---------------------------------------------------------------------------
# Wrapper
# ---------------------------------------------------------------------------
def conv_block_forward(x, conv_w, conv_b, bn_gamma, bn_beta):
    """x: (N, Cin, L); conv_w: (Cout, Cin, 1); conv_b/bn_*: (Cout,).

    conv_b is accepted for API parity but cancels exactly under train-mode
    BatchNorm (added to y, removed by the batch mean), so the kernels skip it.
    """
    n, c_in, length = x.shape
    c_out = conv_w.shape[0]
    w = conv_w.reshape(c_out, c_in).astype(jnp.float32)
    m = n * length

    # Small / non-128-multiple L with enough batch: collapse (N, L) into one
    # lane-dense axis so output stores stay unmasked and tiles stay wide.
    collapsed = (length % 128 != 0) and ((n * length) % 128 == 0) and (n * length >= 256)
    if collapsed:
        xk = jnp.transpose(x, (1, 0, 2)).reshape(1, c_in, n * length)
        nk, lk = 1, n * length
    else:
        xk, nk, lk = x, n, length

    budget = _vmem_budget_bytes()
    tl, tn = _choose_tiles(nk, c_in, c_out, lk, budget)
    nb, lb = nk // tn, lk // tl
    nblk = nb * lb
    grid = (nb, lb)

    params = pltpu.CompilerParams(
        dimension_semantics=("parallel", "parallel"),
        vmem_limit_bytes=int(budget),
    )
    x_spec = pl.BlockSpec((tn, c_in, tl), lambda b, t: (b, 0, t))
    part_map = lambda b, t: (b * lb + t, 0, 0)   # each grid step owns its own partial row

    # ---------------- pass 1: per-block partial statistics ----------------
    if c_in < c_out:
        # Gram stats: Sx = sum_x, G = x x^T (cheaper MXU than W@x when Cin < Cout).
        sx_p, g_p = pl.pallas_call(
            _gram_stats_kernel,
            out_shape=(jax.ShapeDtypeStruct((nblk, c_in, 1), jnp.float32),
                       jax.ShapeDtypeStruct((nblk, c_in, c_in), jnp.float32)),
            grid=grid,
            in_specs=[x_spec],
            out_specs=(pl.BlockSpec((1, c_in, 1), part_map),
                       pl.BlockSpec((1, c_in, c_in), part_map)),
            compiler_params=params,
        )(xk)
        mean_x = jnp.sum(sx_p, axis=0)[:, 0] / m                    # (Cin,)
        mean_y = w @ mean_x                                         # (Cout,)
        cov_x = jnp.sum(g_p, axis=0) / m - jnp.outer(mean_x, mean_x)
        var_y = jnp.einsum("ci,ij,cj->c", w, cov_x, w)              # diag(W Cov W^T)
    else:
        # y stats: Sy = sum(W@x), Sy2 = sum((W@x)^2) — avoids the O(Cin^2) Gram.
        # TODO(synk): when 2*Cout < Cin, additionally write y to HBM here and have
        # pass 2 read y instead of re-reading the wider x.
        sy_p, sy2_p = pl.pallas_call(
            _y_stats_kernel,
            out_shape=(jax.ShapeDtypeStruct((nblk, c_out, 1), jnp.float32),
                       jax.ShapeDtypeStruct((nblk, c_out, 1), jnp.float32)),
            grid=grid,
            in_specs=[x_spec, pl.BlockSpec((c_out, c_in), lambda b, t: (0, 0))],
            out_specs=(pl.BlockSpec((1, c_out, 1), part_map),
                       pl.BlockSpec((1, c_out, 1), part_map)),
            compiler_params=params,
        )(xk, w.astype(x.dtype))
        mean_y = jnp.sum(sy_p, axis=0)[:, 0] / m
        var_y = jnp.sum(sy2_p, axis=0)[:, 0] / m - mean_y * mean_y

    # ------------- tiny glue: fold BN into weight + shift ---------------
    # NOTE: naive (sum/sumsq or Gram) variance in f32; the clamp guards against
    # round-off negatives but not catastrophic cancellation for |mean| >> std.
    var_y = jnp.maximum(var_y, 0.0)
    inv_std = lax.rsqrt(var_y + BN_EPS)
    scale = bn_gamma.astype(jnp.float32) * inv_std                  # (Cout,)
    shift = (bn_beta.astype(jnp.float32) - mean_y * scale).reshape(c_out, 1)
    w_scaled = (scale[:, None] * w).astype(x.dtype)                 # fold scale into W

    # ---------------- pass 2: relu(W_scaled @ x + shift) ------------------
    out_k = pl.pallas_call(
        _apply_kernel,
        out_shape=jax.ShapeDtypeStruct((nk, c_out, lk), x.dtype),
        grid=grid,
        in_specs=[x_spec,
                  pl.BlockSpec((c_out, c_in), lambda b, t: (0, 0)),
                  pl.BlockSpec((c_out, 1), lambda b, t: (0, 0))],
        out_specs=pl.BlockSpec((tn, c_out, tl), lambda b, t: (b, 0, t)),
        compiler_params=params,
    )(xk, w_scaled, shift)

    if collapsed:
        return jnp.transpose(out_k.reshape(c_out, n, length), (1, 0, 2))
    return out_k


def conv_block_reference(x, conv_w, conv_b, bn_gamma, bn_beta):
    """Pure-JAX reference mirroring PyTorch Conv1d(k=1)+BatchNorm1d(train)+ReLU."""
    c_out, c_in, _ = conv_w.shape
    y = jnp.einsum("ncl,oc->nol", x, conv_w.reshape(c_out, c_in)) + conv_b[None, :, None]
    mean = jnp.mean(y, axis=(0, 2), keepdims=True)
    var = jnp.mean((y - mean) ** 2, axis=(0, 2), keepdims=True)  # biased, like BN
    y = bn_gamma[None, :, None] * (y - mean) / jnp.sqrt(var + BN_EPS) + bn_beta[None, :, None]
    return jnp.maximum(y, 0.0)


if __name__ == "__main__":
    key = jax.random.PRNGKey(0)
    configs = [
        (2, 4, 16, 8),     # module-spirit tiny shapes; Gram-stats path, full-extent block
        (16, 4, 64, 8),    # small L, larger batch -> collapsed lane-dense path
        (2, 4, 4096, 8),   # 128-multiple L tiling, Gram path, multi-block grid
        (2, 8, 4096, 8),   # Cin >= Cout -> y-stats path, multi-block grid
    ]
    for (n, c_in, length, c_out) in configs:
        key, kx, kw, kb = jax.random.split(key, 4)
        x = jax.random.normal(kx, (n, c_in, length), dtype=jnp.float32)
        bound = 1.0 / (c_in ** 0.5)
        conv_w = jax.random.uniform(kw, (c_out, c_in, 1), minval=-bound, maxval=bound,
                                    dtype=jnp.float32)
        conv_b = jax.random.uniform(kb, (c_out,), minval=-bound, maxval=bound,
                                    dtype=jnp.float32)
        bn_gamma = jnp.ones((c_out,), dtype=jnp.float32)
        bn_beta = jnp.zeros((c_out,), dtype=jnp.float32)

        out = jax.block_until_ready(
            conv_block_forward(x, conv_w, conv_b, bn_gamma, bn_beta))
        ref = conv_block_reference(x, conv_w, conv_b, bn_gamma, bn_beta)
        assert out.shape == (n, c_out, length), (out.shape, (n, c_out, length))
        assert jnp.allclose(out, ref, atol=2e-4, rtol=2e-4), \
            f"mismatch vs reference for config {(n, c_in, length, c_out)}"

    print("KERNEL_OK")
</pallas_src>

<mosaic_0001>
module attributes {stable_mosaic.version = 11 : i64} {
  func.func @_gram_stats_kernel(%arg0: i32, %arg1: i32, %arg2: memref<2x4x16xf32, #tpu.memory_space<vmem>>, %arg3: memref<1x4x1xf32, #tpu.memory_space<vmem>>, %arg4: memref<1x4x4xf32, #tpu.memory_space<vmem>>) attributes {dimension_semantics = [#tpu.dimension_semantics<parallel>, #tpu.dimension_semantics<parallel>], iteration_bounds = array<i64: 1, 1>, scalar_prefetch = 0 : i64, scratch_operands = 0 : i64, tpu.core_type = #tpu.core_type<tc>, window_params = [{transform_indices = @transform_0, window_bounds = array<i64: 2, 4, 16>}, {transform_indices = @transform_1, window_bounds = array<i64: 1, 4, 1>}, {transform_indices = @transform_2, window_bounds = array<i64: 1, 4, 4>}]} {
    %cst = arith.constant 0.000000e+00 : f32
    %0 = vector.broadcast %cst : f32 to vector<1x4x1xf32>
    %c0 = arith.constant 0 : index
    %c0_0 = arith.constant 0 : index
    %c0_1 = arith.constant 0 : index
    %1 = vector.load %arg3[%c0, %c0_0, %c0_1] : memref<1x4x1xf32, #tpu.memory_space<vmem>>, vector<1x4x1xf32>
    tpu.vector_store %arg3[%c0, %c0_0, %c0_1], %0 {strides = array<i32>} : memref<1x4x1xf32, #tpu.memory_space<vmem>>, vector<1x4x1xf32>,
    %cst_2 = arith.constant 0.000000e+00 : f32
    %2 = vector.broadcast %cst_2 : f32 to vector<1x4x4xf32>
    %c0_3 = arith.constant 0 : index
    %c0_4 = arith.constant 0 : index
    %c0_5 = arith.constant 0 : index
    %3 = vector.load %arg4[%c0_3, %c0_4, %c0_5] : memref<1x4x4xf32, #tpu.memory_space<vmem>>, vector<1x4x4xf32>
    tpu.vector_store %arg4[%c0_3, %c0_4, %c0_5], %2 {strides = array<i32>} : memref<1x4x4xf32, #tpu.memory_space<vmem>>, vector<1x4x4xf32>,
    %c0_i32 = arith.constant 0 : i32
    %c2_i32 = arith.constant 2 : i32
    %4 = arith.addi %c0_i32, %c2_i32 : i32
    %c1_i32 = arith.constant 1 : i32
    scf.for %arg5 = %c0_i32 to %4 step %c1_i32  : i32 {
      %c1_i32_7 = arith.constant 1 : i32
      %5 = arith.muli %arg5, %c1_i32_7 : i32
      %c0_i32_8 = arith.constant 0 : i32
      %6 = arith.addi %c0_i32_8, %5 : i32
      %7 = arith.index_cast %6 : i32 to index
      %c0_9 = arith.constant 0 : index
      %c0_10 = arith.constant 0 : index
      %8 = vector.load %arg2[%7, %c0_9, %c0_10] : memref<2x4x16xf32, #tpu.memory_space<vmem>>, vector<1x4x16xf32>
      %9 = vector.shape_cast %8 : vector<1x4x16xf32> to vector<4x16xf32>
      %c0_11 = arith.constant 0 : index
      %c0_12 = arith.constant 0 : index
      %c0_13 = arith.constant 0 : index
      %10 = vector.load %arg3[%c0_11, %c0_12, %c0_13] : memref<1x4x1xf32, #tpu.memory_space<vmem>>, vector<1x4x1xf32>
      %11 = vector.shape_cast %10 : vector<1x4x1xf32> to vector<4x1xf32>
      %cst_14 = arith.constant dense<0.000000e+00> : vector<4xf32>
      %12 = vector.multi_reduction <add>, %9, %cst_14 [1] : vector<4x16xf32> to vector<4xf32>
      %13 = vector.shape_cast %12 : vector<4xf32> to vector<4x1xf32>
      %14 = arith.addf %11, %13 : vector<4x1xf32>
      %c0_15 = arith.constant 0 : index
      %c0_16 = arith.constant 0 : index
      %c0_17 = arith.constant 0 : index
      %15 = vector.load %arg3[%c0_15, %c0_16, %c0_17] : memref<1x4x1xf32, #tpu.memory_space<vmem>>, vector<1x4x1xf32>
      %16 = vector.shape_cast %15 : vector<1x4x1xf32> to vector<4x1xf32>
      %17 = vector.shape_cast %14 : vector<4x1xf32> to vector<1x4x1xf32>
      tpu.vector_store %arg3[%c0_15, %c0_16, %c0_17], %17 {strides = array<i32>} : memref<1x4x1xf32, #tpu.memory_space<vmem>>, vector<1x4x1xf32>,
      %c0_18 = arith.constant 0 : index
      %c0_19 = arith.constant 0 : index
      %c0_20 = arith.constant 0 : index
      %18 = vector.load %arg4[%c0_18, %c0_19, %c0_20] : memref<1x4x4xf32, #tpu.memory_space<vmem>>, vector<1x4x4xf32>
      %19 = vector.shape_cast %18 : vector<1x4x4xf32> to vector<4x4xf32>
      %cst_21 = arith.constant dense<0.000000e+00> : vector<4x4xf32>
      %20 = tpu.matmul %9, %9, %cst_21 {dimension_numbers = #tpu.dot_dimension_numbers<[1], [1], [0], [0], [0, 0, 1, 0], [], []>} : vector<4x16xf32>, vector<4x16xf32>, vector<4x4xf32> -> vector<4x4xf32>
      %21 = arith.addf %19, %20 : vector<4x4xf32>
      %c0_22 = arith.constant 0 : index
      %c0_23 = arith.constant 0 : index
      %c0_24 = arith.constant 0 : index
      %22 = vector.load %arg4[%c0_22, %c0_23, %c0_24] : memref<1x4x4xf32, #tpu.memory_space<vmem>>, vector<1x4x4xf32>
      %23 = vector.shape_cast %22 : vector<1x4x4xf32> to vector<4x4xf32>
      %24 = vector.shape_cast %21 : vector<4x4xf32> to vector<1x4x4xf32>
      tpu.vector_store %arg4[%c0_22, %c0_23, %c0_24], %24 {strides = array<i32>} : memref<1x4x4xf32, #tpu.memory_space<vmem>>, vector<1x4x4xf32>,
    }
    %c2_i32_6 = arith.constant 2 : i32
    return
  }
  func.func @transform_0(%arg0: i32, %arg1: i32) -> (i32, i32, i32) {
    %c0_i32 = arith.constant 0 : i32
    %c0_i32_0 = arith.constant 0 : i32
    return %arg0, %c0_i32, %arg1 : i32, i32, i32
  }
  func.func @transform_1(%arg0: i32, %arg1: i32) -> (i32, i32, i32) {
    %c1_i32 = arith.constant 1 : i32
    %0 = arith.muli %arg0, %c1_i32 : i32
    %1 = arith.addi %0, %arg1 : i32
    %c0_i32 = arith.constant 0 : i32
    %c0_i32_0 = arith.constant 0 : i32
    %c0_i32_1 = arith.constant 0 : i32
    return %1, %c0_i32, %c0_i32_0 : i32, i32, i32
  }
  func.func @transform_2(%arg0: i32, %arg1: i32) -> (i32, i32, i32) {
    %c1_i32 = arith.constant 1 : i32
    %0 = arith.muli %arg0, %c1_i32 : i32
    %1 = arith.addi %0, %arg1 : i32
    %c0_i32 = arith.constant 0 : i32
    %c0_i32_0 = arith.constant 0 : i32
    %c0_i32_1 = arith.constant 0 : i32
    return %1, %c0_i32, %c0_i32_0 : i32, i32, i32
  }
}

</mosaic_0001>

<bundles_post_ra>
// kernel: tpu_custom_call.1
= control target key start
LH: loop header
LB: loop body
LE: loop exit
PB: predicated region body
PF: predicated region fallthrough
CT: control target
= control target key end

     0   :  { %8 = vsyncpa [#allocation3], 0  ;;  %s322_s0 = inlined_call_operand.hbm [shape: f32[2,4,16], index: 0, kind: input, shape index: {}]   ;;  %s323_s1 = inlined_call_operand.vmem [shape: f32[1,4,1], index: 1, kind: output, shape index: {0}]   ;;  %s324_s2 = inlined_call_operand.hbm [shape: f32[1,4,4], index: 2, kind: output, shape index: {1}]  }
   0x1   :  { %9 = vsyncpa [#allocation4], 0  ;;  %s263_s9 = smov [#allocation2]   ;;  %s207_s13 = scalar_lea.hbm %s322_s0, 128 }
   0x2   :  { %s15_s10 = sshll.u32 %s263_s9, 4  ;;  %p208_p0 = scmp.ne.s32.totalorder %s322_s0, %s207_s13  ;;  %s16_s10 = int_to_ptr.vmem [resolvable:$true] %s15_s10 }
   0x3   :  { %p211_p1 = scmp.lt.u32.totalorder %s207_s13, %s322_s0 }
   0x5   :  { %p213_p2 = pnand %p211_p1, %p208_p0 }
   0x7   :  { %216 = shalt.err (!%p213_p2)
}
   0x8   :  { %s217_s18 = scalar_lea.vmem %s16_s10, 128  ;;  %p222_p4 = scmp.lt.s32.totalorder %s16_s10, %s16_s10 }
   0x9   :  { %p218_p3 = scmp.ne.s32.totalorder %s16_s10, %s217_s18  ;;  %p223_p5 = scmp.lt.s32.totalorder %s217_s18, %s217_s18 }
   0xb   :  { %p224_p6 = por %p223_p5, %p222_p4 }
   0xd   :  { %p225_p7 = pnand %p224_p6, %p218_p3 }
   0xf   :  { %228 = shalt.err (!%p225_p7)
}
  0x10   :  { %s264_s19 = smov 64   ;;  %s265_s20 = smov 4  }
  0x11   :  { %21 = dma.hbm_to_vmem [thread:$0]  %s322_s0, 128, %s16_s10, [#allocation3], %s264_s19, %s264_s19, %s265_s20  }
  0x12   :  { %255 = dma.done.wait [#allocation3], 128  }
  0x13   :  { %256 = vsyncadd [#allocation3], 4294967168  ;;  %vm37_vm0 = vcmask 3072   ;;  %vm39_vm1 = vcmask 27648   ;;  %v266_v0 = vmov 0.0   ;;  %s259_s25 = smov 0  }
  0x14   :  { %38 = vst.msk [vmem:[%s323_s1] sm:$0xf] %vm37_vm0, %v266_v0 }
  0x15   :  { %40 = vst.msk [vmem:[#allocation5] sm:$0xf] %vm39_vm1, %v266_v0 }
  0x16 LB: > { %v267_v1 = vmov 0.0   ;;  %vm268_vm2 = vmmov 0   ;;  %s182_s0 = sshll.u32 %s261_s25, 2  ;;  %vm58_vm3 = vcmask 130048   ;;  %vm51_vm4 = vcmask 125952   ;;  %s46_s25 = sadd.s32 1, %s261_s25   ;;  %s261_s25 = sphi %s259_s25, %s46_s25  }
  0x17   : > { %187 = vmatprep.subr.mxu0 %v267_v1  ;;  %189 = vmatprep.mubr.msk.f32.mxu0 %vm268_vm2, %v267_v1  ;;  %s48_s26 = scalar_lea.vmem [#allocation2], %s182_s0  ;;  %p43_p8 = scmp.ge.s32.totalorder %s46_s25, 2  }
  0x18   : > { %v49_v2 = vld [vmem:[%s48_s26] sm:$0xf]  ;;  %s269_s3 = smov (%p43_p8), [#allocation5]  }
  0x19   : > { %188 = vmatpush3.xpose.msk.msra.mxu0 %vm58_vm3, %v49_v2  ;;  %v52_v3 = vsel %vm51_vm4, %v49_v2, 0.0  ;;  %s151_s4 = sshll.u32 (%p43_p8), %s269_s3, 4  ;;  %s152_s4 = int_to_ptr.vmem [resolvable:$true] %s151_s4 }
  0x1a   : > { %53 = vadd.xlane.f32.xlu0 %v52_v3  ;;  %s229_s5 = scalar_lea.vmem (%p43_p8), %s152_s4, 64  ;;  %p234_p10 = scmp.lt.s32.totalorder (%p43_p8), %s152_s4, %s152_s4 }
  0x1b   : > { %v50_v4 = vld [vmem:[%s323_s1] sm:$0xf]  ;;  %p230_p9 = scmp.ne.s32.totalorder (%p43_p8), %s152_s4, %s229_s5  ;;  %p235_p11 = scmp.lt.s32.totalorder (%p43_p8), %s229_s5, %s229_s5 }
  0x1c   : > { %190 = vmatmul.mubr.msk.f32.vlgmr.msra.gmra.mrb[0].mxu0 %vm58_vm3, %v49_v2  ;;  %v57_v7 = vld [vmem:[#allocation5] sm:$0xf] }
  0x1d   :  { %p236_p12 = por (%p43_p8), %p235_p11, %p234_p10 }
  0x1f   :  { %p237_p13 = pnand (%p43_p8), %p236_p12, %p230_p9 }
  0xa7   : > { %v54_v5 = vpop.xlane.xlu0 %53 }
  0xa8   : > { %v55_v6 = vadd.f32 %v54_v5, %v50_v4 }
  0xaa   : > { %56 = vst.msk [vmem:[%s323_s1] sm:$0xf] %vm37_vm0, %v55_v6 }
  0xec   :  { %45 = sbr.rel (!%p43_p8) target bundleno = 22 (0x16), region = 49 }
  0xef   : > { %v128_v8 = vpop.f32.mrb[0].mxu0 }
  0xf0   : > { %v132_v9 = vadd.f32 %v128_v8, %v57_v7  ;;  %v191_v10 = vpop.f32.mrb[1].mxu0 }
  0xf2   : > { %133 = vst.msk [vmem:[#allocation5] sm:$0xf] %vm39_vm1, %v132_v9 }
  0xf3   :  { %240 = shalt.err (!%p237_p13)
}
  0xf4   :  { %s241_s8 = scalar_lea.hbm %s324_s2, 64 }
  0xf5   :  { %p242_p0 = scmp.ne.s32.totalorder %s324_s2, %s241_s8  ;;  %p245_p1 = scmp.lt.u32.totalorder %s241_s8, %s324_s2 }
  0xf7   :  { %p247_p2 = pnand %p245_p1, %p242_p0 }
  0xf9   :  { %250 = shalt.err (!%p247_p2)
}
  0xfa   :  { %154 = dma.vmem_to_hbm [thread:$0]  %s152_s4, 64, %s324_s2, [#allocation4]  }
  0xfb   :  { %257 = dma.done.wait [#allocation4], 64  }
  0xfc   :  { %258 = vsyncadd [#allocation4], 4294967232 }
  0xfd   :  { %165 = vsyncpa [#allocation3], 1 }
  0xfe   :  { %166 = vsyncpa [#allocation4], 1 }

</bundles_post_ra>
